<compile_context>
chip_gen: v6e
topology: v6e:2x2x1
jax: 0.10.0
libtpu: 0.0.40
codegen_flags: <defaults>
</compile_context>

<pallas_src>
import jax
import jax.numpy as jnp
from jax.experimental import pallas as pl
from jax.experimental.pallas import tpu as pltpu

# Problem sizes (from the PyTorch module: x = randn(1, 3, 8, 8), ConvT 3->4, k=3).
N, H, W = 1, 8, 8
CIN, COUT, K = 3, 4, 3
PAD = 1                      # effective "same"-conv padding of the equivalent conv

M = N * H * W                # 64 output pixels (rows of the im2col matmul)
KD = K * K * CIN + 1         # 28 = 27 taps + 1 ones-column for the bias
COUT_PAD = 128               # lane-dense output width (real channels in [:COUT])


def convt_relu_kernel(p_ref, w_ref, o_ref):
    """p_ref: (M, KD) im2col patches (+ ones column)
       w_ref: (KD, COUT_PAD) flipped/reshaped weight (+ bias row), zero-padded lanes
       o_ref: (M, COUT_PAD) lane-dense output slab"""
    o_ref[...] = jnp.maximum(
        jnp.dot(p_ref[...], w_ref[...], preferred_element_type=jnp.float32),
        0.0,
    )


@jax.jit
def conv_transpose_relu(x_nchw, w_torch, bias):
    """x_nchw: (N, CIN, H, W) f32
       w_torch: (CIN, COUT, K, K)   (PyTorch ConvTranspose2d weight layout)
       bias: (COUT,)
       returns: (N, COUT, H, W) f32"""
    # ---- wrapper glue (fused by XLA under jit; tensors are tiny) ----
    x_nhwc = jnp.transpose(x_nchw, (0, 2, 3, 1))                        # NHWC
    x_pad = jnp.pad(x_nhwc, ((0, 0), (PAD, PAD), (PAD, PAD), (0, 0)))   # (N,H+2,W+2,CIN)

    # im2col: patches[n*H*W + h*W + w, (kh*K+kw)*CIN + ci] = x_pad[n, h+kh, w+kw, ci]
    cols = []
    for kh in range(K):
        for kw in range(K):
            cols.append(x_pad[:, kh:kh + H, kw:kw + W, :].reshape(M, CIN))
    cols.append(jnp.ones((M, 1), jnp.float32))                          # bias column
    patches = jnp.concatenate(cols, axis=1)                             # (M, KD)

    # Equivalent regular-conv weight, flattened to match the im2col column order,
    # bias folded in as an extra row, lanes zero-padded to 128.
    w_eff = jnp.transpose(w_torch[:, :, ::-1, ::-1], (2, 3, 0, 1))      # (K,K,CIN,COUT)
    w_mat = w_eff.reshape(K * K * CIN, COUT)                            # (27, COUT)
    w_mat = jnp.concatenate([w_mat, bias.reshape(1, COUT)], axis=0)     # (KD, COUT)
    w_mat = jnp.pad(w_mat, ((0, 0), (0, COUT_PAD - COUT)))              # (KD, 128)

    # ---- single-matmul Pallas kernel (lane-dense output, ReLU fused) ----
    out_slab = pl.pallas_call(
        convt_relu_kernel,
        out_shape=jax.ShapeDtypeStruct((M, COUT_PAD), jnp.float32),
        in_specs=[
            pl.BlockSpec(memory_space=pltpu.MemorySpace.VMEM),
            pl.BlockSpec(memory_space=pltpu.MemorySpace.VMEM),
        ],
        out_specs=pl.BlockSpec(memory_space=pltpu.MemorySpace.VMEM),
    )(patches, w_mat)

    # back to NCHW
    out_nhwc = out_slab[:, :COUT].reshape(N, H, W, COUT)
    return jnp.transpose(out_nhwc, (0, 3, 1, 2))


def _reference(x, w, b):
    """Independent plain-JAX reference: direct (scatter-form) ConvTranspose2d
       stride=1, padding=1, output_padding=0, followed by ReLU (NCHW)."""
    n, ci, h, wd = x.shape
    full = jnp.zeros((n, COUT, h + K - 1, wd + K - 1), jnp.float32)
    for kh in range(K):
        for kw in range(K):
            contrib = jnp.einsum("ncij,cd->ndij", x, w[:, :, kh, kw])
            full = full.at[:, :, kh:kh + h, kw:kw + wd].add(contrib)
    out = full[:, :, PAD:PAD + h, PAD:PAD + wd] + b.reshape(1, COUT, 1, 1)
    return jnp.maximum(out, 0.0)


if __name__ == "__main__":
    key = jax.random.PRNGKey(0)
    kx, kw, kb = jax.random.split(key, 3)

    # Deterministic synthetic parameters (shapes from ConvTranspose2d(3, 4, 3)).
    x = jax.random.normal(kx, (N, CIN, H, W), dtype=jnp.float32)
    w = jax.random.normal(kw, (CIN, COUT, K, K), dtype=jnp.float32) * 0.1
    b = jax.random.normal(kb, (COUT,), dtype=jnp.float32) * 0.1

    out = conv_transpose_relu(x, w, b)
    out = jax.block_until_ready(out)

    ref = _reference(x, w, b)
    assert out.shape == (N, COUT, H, W)
    assert jnp.allclose(out, ref, atol=1e-5, rtol=1e-5)

    print("KERNEL_OK")
</pallas_src>

<mosaic_0001>
module attributes {stable_mosaic.version = 11 : i64} {
  func.func @convt_relu_kernel(%arg0: memref<64x28xf32, #tpu.memory_space<vmem>>, %arg1: memref<28x128xf32, #tpu.memory_space<vmem>>, %arg2: memref<64x128xf32, #tpu.memory_space<vmem>>) attributes {dimension_semantics = [], scalar_prefetch = 0 : i64, scratch_operands = 0 : i64, tpu.core_type = #tpu.core_type<tc>} {
    %c0 = arith.constant 0 : index
    %c0_0 = arith.constant 0 : index
    %0 = vector.load %arg0[%c0, %c0_0] : memref<64x28xf32, #tpu.memory_space<vmem>>, vector<64x28xf32>
    %c0_1 = arith.constant 0 : index
    %c0_2 = arith.constant 0 : index
    %1 = vector.load %arg1[%c0_1, %c0_2] : memref<28x128xf32, #tpu.memory_space<vmem>>, vector<28x128xf32>
    %cst = arith.constant dense<0.000000e+00> : vector<64x128xf32>
    %2 = tpu.matmul %0, %1, %cst {dimension_numbers = #tpu.dot_dimension_numbers<[1], [0], [0], [1], [0, 0, 1, 1], [], []>} : vector<64x28xf32>, vector<28x128xf32>, vector<64x128xf32> -> vector<64x128xf32>
    %cst_3 = arith.constant 0.000000e+00 : f32
    %3 = vector.broadcast %cst_3 : f32 to vector<64x128xf32>
    %4 = arith.maximumf %2, %3 : vector<64x128xf32>
    %c0_4 = arith.constant 0 : index
    %c0_5 = arith.constant 0 : index
    %5 = vector.load %arg2[%c0_4, %c0_5] : memref<64x128xf32, #tpu.memory_space<vmem>>, vector<64x128xf32>
    tpu.vector_store %arg2[%c0_4, %c0_5], %4 {strides = array<i32>} : memref<64x128xf32, #tpu.memory_space<vmem>>, vector<64x128xf32>,
    return
  }
}

</mosaic_0001>

<bundles_post_ra>
// kernel: conv_transpose_relu.1
= control target key start
LH: loop header
LB: loop body
LE: loop exit
PB: predicated region body
PF: predicated region fallthrough
CT: control target
= control target key end

     0   :  { %vm48_vm0 = vcmask 1043456   ;;  %vm23_vm1 = vcmask 228352   ;;  %s309_s1 = inlined_call_operand.vmem [shape: f32[28,128], index: 1, kind: input, shape index: {}]   ;;  %s310_s0 = inlined_call_operand.vmem [shape: f32[64,28], index: 0, kind: input, shape index: {}]   ;;  %s311_s2 = inlined_call_operand.vmem [shape: f32[64,128], index: 2, kind: output, shape index: {}]  }
   0x1   :  { %v22_v0 = vld [vmem:[%s309_s1 + $0x18] sm:$0xf]  ;;  %v21_v1 = vld [vmem:[%s309_s1 + $0x10] sm:$0xff]  ;;  %v20_v2 = vld [vmem:[%s309_s1 + $0x8] sm:$0xff] }
   0x2   :  { %198 = vmatprep.subr.msk.mxu0 %vm48_vm0, %v22_v0  ;;  %218 = vmatprep.subr.msk.mxu1 %vm48_vm0, %v22_v0  ;;  %v19_v3 = vld [vmem:[%s309_s1] sm:$0xff]  ;;  %v12_v6 = vld [vmem:[%s310_s0 + $0x8] sm:$0xff]  ;;  %v13_v8 = vld [vmem:[%s310_s0 + $0x10] sm:$0xff] }
   0x3   :  { %199 = vmatpush3.msk.msra.mxu0 %vm48_vm0, %v22_v0  ;;  %222 = vmatpush3.msk.msra.mxu1 %vm48_vm0, %v22_v0  ;;  %v11_v4 = vld [vmem:[%s310_s0] sm:$0xff]  ;;  %v16_v7 = vld [vmem:[%s310_s0 + $0x28] sm:$0xff]  ;;  %v17_v9 = vld [vmem:[%s310_s0 + $0x30] sm:$0xff] }
   0x4   :  { %200 = vmatprep.subr.mxu0 %v21_v1  ;;  %219 = vmatprep.subr.mxu1 %v21_v1  ;;  %v15_v5 = vld [vmem:[%s310_s0 + $0x20] sm:$0xff]  ;;  %v14_v10 = vld [vmem:[%s310_s0 + $0x18] sm:$0xff] }
   0x5   :  { %201 = vmatpush3.msra.mxu0 %v21_v1  ;;  %223 = vmatpush3.msra.mxu1 %v21_v1  ;;  %v18_v11 = vld [vmem:[%s310_s0 + $0x38] sm:$0xff] }
   0x6   :  { %202 = vmatprep.subr.mxu0 %v20_v2  ;;  %220 = vmatprep.subr.mxu1 %v20_v2 }
   0x7   :  { %203 = vmatpush3.msra.mxu0 %v20_v2  ;;  %224 = vmatpush3.msra.mxu1 %v20_v2 }
   0x8   :  { %204 = vmatprep.subr.mxu0 %v19_v3  ;;  %221 = vmatprep.subr.mxu1 %v19_v3 }
   0x9   :  { %205 = vmatpush3.msra.mxu0 %v19_v3  ;;  %225 = vmatpush3.msra.mxu1 %v19_v3 }
   0xa   :  { %206 = vmatprep.mubr.msk.f32.mxu0 %vm23_vm1, %v11_v4  ;;  %212 = vmatprep.mubr.msk.f32.mxu1 %vm23_vm1, %v15_v5 }
   0xb   :  { %207 = vmatmul.mubr.msk.f32.vlgmr.msra.gmra.mxu0 %vm23_vm1, %v12_v6  ;;  %213 = vmatmul.mubr.msk.f32.vlgmr.msra.gmra.mxu1 %vm23_vm1, %v16_v7 }
   0xc   :  { %209 = vmatprep.mubr.msk.f32.mxu0 %vm23_vm1, %v13_v8  ;;  %215 = vmatprep.mubr.msk.f32.mxu1 %vm23_vm1, %v17_v9 }
   0xf   :  { %210 = vmatmul.mubr.msk.f32.gmra.mxu0 %vm23_vm1, %v14_v10  ;;  %216 = vmatmul.mubr.msk.f32.gmra.mxu1 %vm23_vm1, %v18_v11 }
  0xcb   :  { %v208_v12 = vpop.f32.mrf.mxu0  ;;  %v214_v13 = vpop.f32.mrf.mxu1 }
  0xcc   :  { %v158_v14 = vmax.f32 %v208_v12, 0.0  ;;  %v162_v15 = vmax.f32 %v214_v13, 0.0 }
  0xcd   :  { %v118_v16 = vpop.f32.mrf.mxu0  ;;  %v138_v17 = vpop.f32.mrf.mxu1 }
  0xce   :  { %166 = vst [vmem:[%s311_s2 + $0x8] sm:$0xff] %v158_v14  ;;  %170 = vst [vmem:[%s311_s2 + $0x28] sm:$0xff] %v162_v15  ;;  %v157_v18 = vmax.f32 %v118_v16, 0.0  ;;  %v161_v19 = vmax.f32 %v138_v17, 0.0 }
  0xcf   :  { %v211_v20 = vpop.f32.mrf.mxu0  ;;  %v217_v21 = vpop.f32.mrf.mxu1 }
  0xd0   :  { %165 = vst [vmem:[%s311_s2] sm:$0xff] %v157_v18  ;;  %169 = vst [vmem:[%s311_s2 + $0x20] sm:$0xff] %v161_v19  ;;  %v160_v22 = vmax.f32 %v211_v20, 0.0  ;;  %v164_v23 = vmax.f32 %v217_v21, 0.0 }
  0xd1   :  { %v128_v24 = vpop.f32.mrf.mxu0  ;;  %v148_v25 = vpop.f32.mrf.mxu1 }
  0xd2   :  { %168 = vst [vmem:[%s311_s2 + $0x18] sm:$0xff] %v160_v22  ;;  %172 = vst [vmem:[%s311_s2 + $0x38] sm:$0xff] %v164_v23  ;;  %v159_v26 = vmax.f32 %v128_v24, 0.0  ;;  %v163_v27 = vmax.f32 %v148_v25, 0.0 }
  0xd4   :  { %167 = vst [vmem:[%s311_s2 + $0x10] sm:$0xff] %v159_v26  ;;  %171 = vst [vmem:[%s311_s2 + $0x30] sm:$0xff] %v163_v27 }

</bundles_post_ra>
